<compile_context>
chip_gen: v6e
topology: v6e:2x2x1
jax: 0.10.0
libtpu: 0.0.40
codegen_flags: <defaults>
</compile_context>

<pallas_src>
import functools

import jax
import jax.numpy as jnp
from jax import lax
from jax.experimental import pallas as pl
from jax.experimental.pallas import tpu as pltpu

EPS = 1e-8


# --------------------------------------------------------------------------
# Fused similarity kernel: one batched MXU contraction produces both the
# annotation-vs-content similarities and the projection-vs-content similarity.
# --------------------------------------------------------------------------
def _sim_kernel(q_ref, cot_ref, wq_ref, wco_ref, out_ref):
    # q_ref:   (Bt, Na+1, D)  bf16  rows 0..Na-1 = annotations, row Na = proj
    # cot_ref: (Bt, Nc,   D)  bf16
    # wq_ref:  (Bt, Na+1, 1)  f32   squared norms of q rows (from f32 originals)
    # wco_ref: (Bt, 1,   Nc)  f32   squared norms of contents
    # out_ref: (Bt, 2,   Nc)  f32   row 0 = gt max sim, row 1 = pred sim
    na = q_ref.shape[1] - 1

    # Single batched MXU push, f32 accumulation; D is contracted on the last
    # axis of both operands so no transposed HBM copy is ever needed.
    s = jnp.einsum('bqd,bcd->bqc', q_ref[...], cot_ref[...],
                   preferred_element_type=jnp.float32)          # (Bt, Na+1, Nc)

    # PyTorch CosineSimilarity: w12 / sqrt(max(w1*w2, eps^2)).  rsqrt -> EUP.
    sim = s * lax.rsqrt(jnp.maximum(wq_ref[...] * wco_ref[...], EPS * EPS))

    out_ref[:, 0:1, :] = jnp.max(sim[:, :na, :], axis=1, keepdims=True)  # gt
    out_ref[:, 1:2, :] = sim[:, na:, :]                                  # pred


def _choose_bt(batch, cap=8):
    """Largest divisor of `batch` that is <= cap (batches per grid step)."""
    bt = 1
    for c in range(1, min(batch, cap) + 1):
        if batch % c == 0:
            bt = c
    return bt


@functools.partial(jax.jit, static_argnames=("patch",))
def image_osm_sim_forward(annotations, contents, images, params, patch):
    B, C, H, W = images.shape
    nH, nW = H // patch, W // patch
    Cp = C * patch * patch
    _, Na, D = annotations.shape
    _, Nc, _ = contents.shape

    # ---- vision stub, hoisted to XLA --------------------------------------
    # TODO(synk): full CLIP ViT blocks (LayerNorm/attention/GELU) are not
    # reproduced; the CLS token is a synthetic class_embedding + mean-pooled
    # linear patch embedding.  Because that path is purely linear, pooling
    # BEFORE the patch matmul is exact:  mean_p(P@Wp + bp) == mean_p(P)@Wp + bp.
    pooled = images.reshape(B, C, nH, patch, nW, patch).mean(axis=(2, 4))
    pooled = pooled.reshape(B, Cp)                                     # (B, Cp)
    cls = pooled @ params["w_patch"] + params["b_patch"] + params["cls_emb"]
    proj = cls @ params["w_lin"] + params["b_lin"]                     # (B, D) f32

    # ---- f32 norms from the ORIGINAL f32 tensors (PyTorch eps semantics) ---
    w_an = jnp.sum(annotations * annotations, axis=-1, keepdims=True)  # (B, Na, 1)
    w_pr = jnp.sum(proj * proj, axis=-1, keepdims=True)[:, :, None]    # (B, 1, 1)
    w_q = jnp.concatenate([w_an, w_pr], axis=1)                        # (B, Na+1, 1)
    w_co = jnp.sum(contents * contents, axis=-1)[:, None, :]           # (B, 1, Nc)

    # ---- bf16 MXU operands: append projection as an extra "query" row ------
    q = jnp.concatenate([annotations, proj[:, None, :]], axis=1)       # (B, Na+1, D)
    q_bf = q.astype(jnp.bfloat16)
    cot_bf = contents.astype(jnp.bfloat16)

    # ---- fused Pallas kernel over Bt batch elements per grid step ----------
    Bt = _choose_bt(B)
    grid = (B // Bt,)

    bytes_accessed = (2 * B * (Na + 1) * D        # q (bf16)
                      + 2 * B * Nc * D            # contents (bf16)
                      + 4 * B * (Na + 1)          # w_q (f32)
                      + 4 * B * Nc                # w_co (f32)
                      + 4 * B * 2 * Nc)           # out (f32)
    cost = pl.CostEstimate(flops=2 * B * (Na + 1) * D * Nc,
                           transcendentals=0,
                           bytes_accessed=bytes_accessed)

    # TODO(synk): for production shapes with Nc << 128, pack several batches'
    # contents along the lane axis and do a segmented (masked) max so stores
    # are unmasked full-width; on v7x use pltpu.CORE_PARALLEL on the batch
    # axis once the grid has enough steps per core.
    out = pl.pallas_call(
        _sim_kernel,
        out_shape=jax.ShapeDtypeStruct((B, 2, Nc), jnp.float32),
        grid=grid,
        in_specs=[
            pl.BlockSpec((Bt, Na + 1, D), lambda b: (b, 0, 0)),   # q (bf16)
            pl.BlockSpec((Bt, Nc, D), lambda b: (b, 0, 0)),       # contents (bf16)
            pl.BlockSpec((Bt, Na + 1, 1), lambda b: (b, 0, 0)),   # q norms (f32)
            pl.BlockSpec((Bt, 1, Nc), lambda b: (b, 0, 0)),       # content norms
        ],
        out_specs=pl.BlockSpec((Bt, 2, Nc), lambda b: (b, 0, 0)),  # [gt; pred]
        compiler_params=pltpu.CompilerParams(
            dimension_semantics=("parallel",),
            vmem_limit_bytes=64 << 20),   # allow larger Bt blocks than the scoped default
        cost_estimate=cost,
    )(q_bf, cot_bf, w_q, w_co)

    return out[:, 0, :], out[:, 1, :]                               # (B, Nc) x2


# --------------------------------------------------------------------------
# Plain-JAX reference (same synthetic vision stub) for correctness checking
# --------------------------------------------------------------------------
def _cos_sim_ref(x, y):
    w12 = jnp.sum(x * y, axis=-1)
    w1 = jnp.sum(x * x, axis=-1)
    w2 = jnp.sum(y * y, axis=-1)
    return w12 / jnp.sqrt(jnp.maximum(w1 * w2, EPS * EPS))


def reference_forward(annotations, contents, images, params, patch):
    B, C, H, W = images.shape
    nH, nW = H // patch, W // patch
    patches = images.reshape(B, C, nH, patch, nW, patch)
    patches = patches.transpose(0, 2, 4, 1, 3, 5).reshape(B, nH * nW, -1)
    tokens = patches @ params["w_patch"] + params["b_patch"]
    cls = params["cls_emb"] + jnp.mean(tokens, axis=1)               # (B, Hv)
    sim = _cos_sim_ref(annotations[:, None, :, :], contents[:, :, None, :])
    gt = jnp.max(sim, axis=2)                                        # (B, Nc)
    proj = cls @ params["w_lin"] + params["b_lin"]                   # (B, D)
    pred = _cos_sim_ref(contents, proj[:, None, :])                  # (B, Nc)
    return gt, pred


if __name__ == "__main__":
    key = jax.random.PRNGKey(0)
    kA, kC, kI, k1, k2, k3, k4, k5 = jax.random.split(key, 8)

    B, C, H, W = 2, 3, 16, 16
    PATCH = 8
    HV = 32          # vision hidden size
    D = 32           # sentence embedding dim
    NA, NC = 8, 8    # num annotations / contents per batch

    annotations = jax.random.normal(kA, (B, NA, D), dtype=jnp.float32)
    contents = jax.random.normal(kC, (B, NC, D), dtype=jnp.float32)
    images = jax.random.normal(kI, (B, C, H, W), dtype=jnp.float32)

    CP = C * PATCH * PATCH
    params = {
        "w_patch": jax.random.normal(k1, (CP, HV), jnp.float32) * 0.05,
        "b_patch": jax.random.normal(k2, (1, HV), jnp.float32) * 0.01,
        "cls_emb": jax.random.normal(k3, (1, HV), jnp.float32) * 0.02,
        "w_lin":   jax.random.normal(k4, (HV, D), jnp.float32) * 0.05,
        "b_lin":   jax.random.normal(k5, (1, D), jnp.float32) * 0.01,
    }

    gt, pred = image_osm_sim_forward(annotations, contents, images, params, PATCH)
    jax.block_until_ready((gt, pred))

    gt_ref, pred_ref = reference_forward(annotations, contents, images, params, PATCH)
    assert gt.shape == (B, NC) and pred.shape == (B, NC)
    # Tolerance covers bf16 MXU operands (f32 accumulation, f32 norms).
    assert jnp.allclose(gt, gt_ref, rtol=2e-2, atol=2e-2)
    assert jnp.allclose(pred, pred_ref, rtol=2e-2, atol=2e-2)

    print("KERNEL_OK")
</pallas_src>

<mosaic_0001>
module attributes {stable_mosaic.version = 11 : i64} {
  func.func @_sim_kernel(%arg0: i32, %arg1: memref<2x9x32xbf16, #tpu.memory_space<vmem>>, %arg2: memref<2x8x32xbf16, #tpu.memory_space<vmem>>, %arg3: memref<2x9x1xf32, #tpu.memory_space<vmem>>, %arg4: memref<2x1x8xf32, #tpu.memory_space<vmem>>, %arg5: memref<2x2x8xf32, #tpu.memory_space<vmem>>) attributes {dimension_semantics = [#tpu.dimension_semantics<parallel>], iteration_bounds = array<i64: 1>, scalar_prefetch = 0 : i64, scratch_operands = 0 : i64, tpu.core_type = #tpu.core_type<tc>, window_params = [{transform_indices = @transform_0, window_bounds = array<i64: 2, 9, 32>}, {transform_indices = @transform_1, window_bounds = array<i64: 2, 8, 32>}, {transform_indices = @transform_2, window_bounds = array<i64: 2, 9, 1>}, {transform_indices = @transform_3, window_bounds = array<i64: 2, 1, 8>}, {transform_indices = @transform_4, window_bounds = array<i64: 2, 2, 8>}]} {
    %c0 = arith.constant 0 : index
    %c0_0 = arith.constant 0 : index
    %c0_1 = arith.constant 0 : index
    %0 = vector.load %arg1[%c0, %c0_0, %c0_1] : memref<2x9x32xbf16, #tpu.memory_space<vmem>>, vector<2x9x32xbf16>
    %c0_2 = arith.constant 0 : index
    %c0_3 = arith.constant 0 : index
    %c0_4 = arith.constant 0 : index
    %1 = vector.load %arg2[%c0_2, %c0_3, %c0_4] : memref<2x8x32xbf16, #tpu.memory_space<vmem>>, vector<2x8x32xbf16>
    "tpu.trace_start"() <{level = 10 : i32, message = "bqd,bcd->bqc"}> : () -> ()
    %cst = arith.constant dense<0.000000e+00> : vector<2x9x8xf32>
    %2 = tpu.matmul %0, %1, %cst {dimension_numbers = #tpu.dot_dimension_numbers<[2], [2], [1], [1], [0, 0, 0, 1, 1, 1], [0], [0]>} : vector<2x9x32xbf16>, vector<2x8x32xbf16>, vector<2x9x8xf32> -> vector<2x9x8xf32>
    "tpu.trace_stop"() : () -> ()
    %c0_5 = arith.constant 0 : index
    %c0_6 = arith.constant 0 : index
    %c0_7 = arith.constant 0 : index
    %3 = vector.load %arg3[%c0_5, %c0_6, %c0_7] : memref<2x9x1xf32, #tpu.memory_space<vmem>>, vector<2x9x1xf32>
    %c0_8 = arith.constant 0 : index
    %c0_9 = arith.constant 0 : index
    %c0_10 = arith.constant 0 : index
    %4 = vector.load %arg4[%c0_8, %c0_9, %c0_10] : memref<2x1x8xf32, #tpu.memory_space<vmem>>, vector<2x1x8xf32>
    %5 = vector.broadcast %3 : vector<2x9x1xf32> to vector<2x9x8xf32>
    %6 = vector.broadcast %4 : vector<2x1x8xf32> to vector<2x9x8xf32>
    %7 = arith.mulf %5, %6 : vector<2x9x8xf32>
    %cst_11 = arith.constant 1.000000e-16 : f32
    %8 = vector.broadcast %cst_11 : f32 to vector<2x9x8xf32>
    %9 = arith.maximumf %7, %8 : vector<2x9x8xf32>
    %10 = math.rsqrt %9 : vector<2x9x8xf32>
    %11 = arith.mulf %2, %10 : vector<2x9x8xf32>
    %12 = vector.extract_strided_slice %11 {offsets = [0, 0, 0], sizes = [2, 8, 8], strides = [1, 1, 1]} : vector<2x9x8xf32> to vector<2x8x8xf32>
    %cst_12 = arith.constant dense<0xFF800000> : vector<2x8xf32>
    %13 = vector.multi_reduction <maximumf>, %12, %cst_12 [1] : vector<2x8x8xf32> to vector<2x8xf32>
    %14 = vector.shape_cast %13 : vector<2x8xf32> to vector<2x1x8xf32>
    %c0_13 = arith.constant 0 : index
    %c0_14 = arith.constant 0 : index
    %c0_15 = arith.constant 0 : index
    %15 = vector.load %arg5[%c0_13, %c0_14, %c0_15] : memref<2x2x8xf32, #tpu.memory_space<vmem>>, vector<2x1x8xf32>
    tpu.vector_store %arg5[%c0_13, %c0_14, %c0_15], %14 {strides = array<i32>} : memref<2x2x8xf32, #tpu.memory_space<vmem>>, vector<2x1x8xf32>,
    %16 = vector.extract_strided_slice %11 {offsets = [0, 8, 0], sizes = [2, 1, 8], strides = [1, 1, 1]} : vector<2x9x8xf32> to vector<2x1x8xf32>
    %c0_16 = arith.constant 0 : index
    %c1 = arith.constant 1 : index
    %c0_17 = arith.constant 0 : index
    %17 = vector.load %arg5[%c0_16, %c1, %c0_17] : memref<2x2x8xf32, #tpu.memory_space<vmem>>, vector<2x1x8xf32>
    tpu.vector_store %arg5[%c0_16, %c1, %c0_17], %16 {strides = array<i32>} : memref<2x2x8xf32, #tpu.memory_space<vmem>>, vector<2x1x8xf32>,
    return
  }
  func.func @transform_0(%arg0: i32) -> (i32, i32, i32) {
    %c0_i32 = arith.constant 0 : i32
    %c0_i32_0 = arith.constant 0 : i32
    %c0_i32_1 = arith.constant 0 : i32
    return %arg0, %c0_i32, %c0_i32_0 : i32, i32, i32
  }
  func.func @transform_1(%arg0: i32) -> (i32, i32, i32) {
    %c0_i32 = arith.constant 0 : i32
    %c0_i32_0 = arith.constant 0 : i32
    %c0_i32_1 = arith.constant 0 : i32
    return %arg0, %c0_i32, %c0_i32_0 : i32, i32, i32
  }
  func.func @transform_2(%arg0: i32) -> (i32, i32, i32) {
    %c0_i32 = arith.constant 0 : i32
    %c0_i32_0 = arith.constant 0 : i32
    %c0_i32_1 = arith.constant 0 : i32
    return %arg0, %c0_i32, %c0_i32_0 : i32, i32, i32
  }
  func.func @transform_3(%arg0: i32) -> (i32, i32, i32) {
    %c0_i32 = arith.constant 0 : i32
    %c0_i32_0 = arith.constant 0 : i32
    %c0_i32_1 = arith.constant 0 : i32
    return %arg0, %c0_i32, %c0_i32_0 : i32, i32, i32
  }
  func.func @transform_4(%arg0: i32) -> (i32, i32, i32) {
    %c0_i32 = arith.constant 0 : i32
    %c0_i32_0 = arith.constant 0 : i32
    %c0_i32_1 = arith.constant 0 : i32
    return %arg0, %c0_i32, %c0_i32_0 : i32, i32, i32
  }
}

</mosaic_0001>

<bundles_post_ra>
// kernel: image_osm_sim_forward.1
= control target key start
LH: loop header
LB: loop body
LE: loop exit
PB: predicated region body
PF: predicated region fallthrough
CT: control target
= control target key end

     0   :  { %vm29_vm0 = vcmask 261120   ;;  %v244_v0 = vmov 0.0   ;;  %vm245_vm1 = vmmov 0   ;;  %v246_v5 = vmov 0   ;;  %s322_s1 = inlined_call_operand.vmem [shape: bf16[2,8,32], index: 1, kind: input, shape index: {}]   ;;  %s323_s0 = inlined_call_operand.vmem [shape: bf16[2,9,32], index: 0, kind: input, shape index: {}]   ;;  %s324_s2 = inlined_call_operand.vmem [shape: f32[2,9,1], index: 2, kind: input, shape index: {}]   ;;  %s325_s3 = inlined_call_operand.vmem [shape: f32[2,1,8], index: 3, kind: input, shape index: {}]   ;;  %s326_s4 = inlined_call_operand.vmem [shape: f32[2,2,8], index: 4, kind: output, shape index: {}]  }
   0x1   :  { %217 = vmatprep.subr.bf16.mxu0 %v244_v0  ;;  %223 = vmatprep.subr.bf16.mxu1 %v244_v0  ;;  %v22_v1 = vld [vmem:[%s322_s1] sm:$0xf]  ;;  %v23_v2 = vld [vmem:[%s322_s1 + $0x4] sm:$0xf]  ;;  %v130_v7 = vld [vmem:[%s324_s2 + $0x8] sm:$0x1] }
   0x2   :  { %v34_v3 = vsel %vm29_vm0, %v22_v1, 0  ;;  %v86_v4 = vsel %vm29_vm0, %v23_v2, 0  ;;  %219 = vmatprep.mubr.msk.bf16.mxu0 %vm245_vm1, %v244_v0  ;;  %225 = vmatprep.mubr.msk.bf16.mxu1 %vm245_vm1, %v244_v0  ;;  %v129_v6 = vld [vmem:[%s324_s2] sm:$0xff]  ;;  %v235_v9 = vld [vmem:[%s323_s0 + $0x8] sm:$0x1f]   ;;  %v131_v10 = vld [vmem:[%s324_s2 + $0x10] sm:$0xff] }
   0x3   :  { %218 = vmatpush3.bf16.xpose.msra.mxu0 %v34_v3  ;;  %224 = vmatpush3.bf16.xpose.msra.mxu1 %v86_v4  ;;  %v234_v8 = vld [vmem:[%s323_s0] sm:$0x1f]   ;;  %v132_v11 = vld [vmem:[%s324_s2 + $0x18] sm:$0x1]  ;;  %vm183_vm2 = vcmask 64512   ;;  %vm198_vm3 = vcmask 57344  }
   0x4   :  { %232 = vset.pattern.permute.xlu0 %v246_v5  ;;  %233 = vset.pattern.permute.xlu1 %v246_v5  ;;  %v211_v14 = vld [vmem:[%s325_s3] ss:$0 sm:$0xff]  ;;  %v212_v15 = vld [vmem:[%s325_s3 + $0x1] ss:$0 sm:$0xff] }
   0x5   :  { %137 = vperm.xlu0 %232, %v129_v6   ;;  %142 = vperm.xlu1 %233, %v130_v7  }
   0x9   :  { %147 = vperm.xlu0 %232, %v131_v10   ;;  %152 = vperm.xlu1 %233, %v132_v11  }
   0xa   :  { %220 = vmatmul.mubr.msk.bf16.vlgmr.msra.gmra.mxu0 %vm29_vm0, %v234_v8  ;;  %226 = vmatmul.mubr.msk.bf16.vlgmr.msra.gmra.mxu1 %vm29_vm0, %v235_v9 }
  0x80   :  { %v138_v12 = vpop.permute.xlu0 %137  ;;  %v143_v13 = vpop.permute.xlu1 %142 }
  0x81   :  { %v167_v17 = vmul.f32 %v211_v14, %v138_v12  ;;  %v168_v20 = vmul.f32 %v211_v14, %v143_v13 }
  0x83   :  { %v171_v22 = vmax.f32 %v167_v17, 1e-16  ;;  %v172_v24 = vmax.f32 %v168_v20, 1e-16 }
  0x84   :  { %v148_v16 = vpop.permute.xlu0 %147  ;;  %v153_v18 = vpop.permute.xlu1 %152 }
  0x85   :  { %v169_v19 = vmul.f32 %v212_v15, %v148_v16  ;;  %v170_v21 = vmul.f32 %v212_v15, %v153_v18  ;;  %236 = vrsqrt.f32 %v171_v22 }
  0x87   :  { %v173_v23 = vmax.f32 %v169_v19, 1e-16  ;;  %v174_v25 = vmax.f32 %v170_v21, 1e-16 }
  0x89   :  { %238 = vrsqrt.f32 %v173_v23 }
  0x8a   :  { %240 = vrsqrt.f32 %v172_v24 }
  0x8b   :  { %242 = vrsqrt.f32 %v174_v25 }
  0x92   :  { %v237_v26 = vpop.eup %236 }
  0x96   :  { %v239_v27 = vpop.eup %238 }
  0x97   :  { %v241_v30 = vpop.eup %240 }
  0x98   :  { %v243_v33 = vpop.eup %242 }
  0xca   :  { %v70_v28 = vpop.f32.mrf.mxu0  ;;  %v122_v29 = vpop.f32.mrf.mxu1 }
  0xcb   :  { %v179_v31 = vmul.f32 %v237_v26, %v70_v28  ;;  %v181_v32 = vmul.f32 %v239_v27, %v122_v29 }
  0xcc   :  { %v221_v34 = vpop.f32.mrf.mxu0  ;;  %v227_v35 = vpop.f32.mrf.mxu1 }
  0xcd   :  { %v184_v36 = vsel %vm183_vm2, %v179_v31, -inf  ;;  %v191_v37 = vsel %vm183_vm2, %v181_v32, -inf }
  0xce   :  { %v185_v38 = vrot.slane %v184_v36, 4  ;;  %v192_v39 = vrot.slane %v191_v37, 4  ;;  %v73_v40 = vpop.f32.mrf.mxu0  ;;  %v125_v41 = vpop.f32.mrf.mxu1 }
  0xcf   :  { %v180_v42 = vmul.f32 %v241_v30, %v73_v40  ;;  %v182_v43 = vmul.f32 %v243_v33, %v125_v41 }
  0xd0   :  { %v186_v44 = vmax.f32 %v184_v36, %v185_v38  ;;  %v193_v45 = vmax.f32 %v191_v37, %v192_v39  ;;  %v222_v46 = vpop.f32.mrf.mxu0  ;;  %v228_v47 = vpop.f32.mrf.mxu1 }
  0xd1   :  { %201 = vst.msk [vmem:[%s326_s4 + $0x1] sm:$0x1] %vm198_vm3, %v180_v42  ;;  %202 = vst.msk [vmem:[%s326_s4 + $0x3] sm:$0x1] %vm198_vm3, %v182_v43 }
  0xd2   :  { %v187_v48 = vrot.slane %v186_v44, 2  ;;  %v194_v49 = vrot.slane %v193_v45, 2 }
  0xd4   :  { %v188_v50 = vmax.f32 %v186_v44, %v187_v48  ;;  %v195_v51 = vmax.f32 %v193_v45, %v194_v49 }
  0xd6   :  { %v189_v52 = vrot.slane %v188_v50, 1  ;;  %v196_v53 = vrot.slane %v195_v51, 1 }
  0xd8   :  { %v190_v54 = vmax.f32 %v188_v50, %v189_v52  ;;  %v197_v55 = vmax.f32 %v195_v51, %v196_v53 }
  0xda   :  { %199 = vst.msk [vmem:[%s326_s4] sm:$0x1] %vm198_vm3, %v190_v54  ;;  %200 = vst.msk [vmem:[%s326_s4 + $0x2] sm:$0x1] %vm198_vm3, %v197_v55 }

</bundles_post_ra>
